<compile_context>
chip_gen: v7x
topology: tpu7x:2x2x1
jax: 0.10.0
libtpu: 0.0.40
codegen_flags: <defaults>
</compile_context>

<pallas_src>
import functools

import jax
import jax.numpy as jnp
import numpy as np
from jax.experimental import pallas as pl
from jax.experimental.pallas import tpu as pltpu


def _round_up(x, m):
    return ((x + m - 1) // m) * m


def _exp_gamma_kernel(x1_ref, x2_ref, x1t_ref, x2t_ref,
                      x1sq_c_ref, x2sq_c_ref, x1sq_r_ref, x2sq_r_ref,
                      o_ref, *, gamma, neg2_inv_ls2):
    c = jnp.float32(neg2_inv_ls2)

    # Squared scaled distances via ||u||^2 + ||v||^2 - 2<u,v>; the 1/ls^2
    # factor is already folded into the precomputed norms and into `c`.
    # d1: tile (i, j) of D      -> rows of x1, cols of x2
    sq1 = (x1sq_c_ref[...] + x2sq_r_ref[...]
           + c * jnp.dot(x1_ref[...], x2t_ref[...],
                         preferred_element_type=jnp.float32))
    # d2: tile (i, j) of D.T    -> rows of x2, cols of x1
    sq2 = (x2sq_c_ref[...] + x1sq_r_ref[...]
           + c * jnp.dot(x2_ref[...], x1t_ref[...],
                         preferred_element_type=jnp.float32))

    # clamp happens BEFORE symmetrization (matches torch: clamp(D), then
    # (D + D.T)/2 — every element of D was clamped, hence clamp d1 and d2
    # independently).
    d1 = jnp.maximum(jnp.sqrt(jnp.maximum(sq1, 0.0)), 1e-36)
    d2 = jnp.maximum(jnp.sqrt(jnp.maximum(sq2, 0.0)), 1e-36)
    d_sym = 0.5 * (d1 + d2)

    # gamma is a Python float -> specialize at trace time (saves EUP work).
    if gamma == 1.0:
        p = d_sym
    elif gamma == 0.5:
        p = jnp.sqrt(d_sym)
    else:
        p = d_sym ** jnp.float32(gamma)

    o_ref[...] = jnp.exp(-p)


def exponential_gamma_kernel(x1, x2, *, gamma, lengthscale=1.0,
                             tm=128, tn=256):
    gamma = float(gamma)
    lengthscale = float(lengthscale)
    assert 0.0 < gamma <= 1.0, "gamma must be in (0, 1]"

    n1, d = x1.shape
    n2, d2 = x2.shape
    assert d == d2
    # (D + D.T) symmetrization requires a square kernel matrix.
    assert n1 == n2, "ExponentialGammaKernel symmetrization needs n1 == n2"
    n = n1

    x1 = x1.astype(jnp.float32)
    x2 = x2.astype(jnp.float32)

    # --- tile / padding selection (handles N not divisible by tiles) -------
    n_pad = _round_up(max(n, 128), 128)
    tm = min(tm, n_pad)
    tn = min(tn, n_pad)
    if n_pad % tm:
        tm = 128
    if n_pad % tn:
        tn = 128
    assert n_pad % tm == 0 and n_pad % tn == 0
    assert tm % 8 == 0 and tn % 128 == 0

    pad = n_pad - n
    if pad:
        x1 = jnp.pad(x1, ((0, pad), (0, 0)))
        x2 = jnp.pad(x2, ((0, pad), (0, 0)))

    # --- hoisted, done-once preprocessing ----------------------------------
    inv_ls2 = 1.0 / (lengthscale * lengthscale)
    x1sq = jnp.sum(x1 * x1, axis=1) * inv_ls2       # (n_pad,)
    x2sq = jnp.sum(x2 * x2, axis=1) * inv_ls2
    x1sq_col = x1sq[:, None]                        # (n_pad, 1)
    x2sq_col = x2sq[:, None]
    x1sq_row = x1sq[None, :]                        # (1, n_pad)
    x2sq_row = x2sq[None, :]
    x1t = x1.T                                      # (d, n_pad) one-time transpose
    x2t = x2.T

    grid = (n_pad // tm, n_pad // tn)
    kernel = functools.partial(_exp_gamma_kernel,
                               gamma=gamma,
                               neg2_inv_ls2=-2.0 * inv_ls2)

    grid_spec = pltpu.PrefetchScalarGridSpec(
        num_scalar_prefetch=0,
        grid=grid,
        in_specs=[
            pl.BlockSpec((tm, d), lambda i, j: (i, 0)),   # x1 row block
            pl.BlockSpec((tm, d), lambda i, j: (i, 0)),   # x2 row block
            pl.BlockSpec((d, tn), lambda i, j: (0, j)),   # x1^T col block
            pl.BlockSpec((d, tn), lambda i, j: (0, j)),   # x2^T col block
            pl.BlockSpec((tm, 1), lambda i, j: (i, 0)),   # ||x1||^2/ls^2 (col)
            pl.BlockSpec((tm, 1), lambda i, j: (i, 0)),   # ||x2||^2/ls^2 (col)
            pl.BlockSpec((1, tn), lambda i, j: (0, j)),   # ||x1||^2/ls^2 (row)
            pl.BlockSpec((1, tn), lambda i, j: (0, j)),   # ||x2||^2/ls^2 (row)
        ],
        out_specs=pl.BlockSpec((tm, tn), lambda i, j: (i, j)),
    )

    out = pl.pallas_call(
        kernel,
        out_shape=jax.ShapeDtypeStruct((n_pad, n_pad), jnp.float32),
        grid_spec=grid_spec,
        compiler_params=pltpu.CompilerParams(
            dimension_semantics=("parallel", "parallel")),
        cost_estimate=pl.CostEstimate(
            flops=4 * n_pad * n_pad * d,            # two (TM,D)x(D,TN) matmuls
            transcendentals=3 * n_pad * n_pad,      # 2 sqrt + exp (gamma=0.5 adds 1)
            bytes_accessed=4 * (n_pad * n_pad + 4 * n_pad * d),
        ),
    )(x1, x2, x1t, x2t, x1sq_col, x2sq_col, x1sq_row, x2sq_row)

    if pad:
        out = out[:n, :n]
    return out


def _reference(x1, x2, gamma, lengthscale):
    a = x1 / lengthscale
    b = x2 / lengthscale
    diff = a[:, None, :] - b[None, :, :]
    dist = jnp.sqrt(jnp.sum(diff * diff, axis=-1))
    dist = jnp.maximum(dist, 1e-36)
    dist = 0.5 * (dist + dist.T)
    return jnp.exp(-(dist ** gamma))


if __name__ == "__main__":
    key = jax.random.PRNGKey(0)
    k1, k2, k3, k4 = jax.random.split(key, 4)

    # Case 1: tile-aligned N, gamma = 0.5 (sqrt fast path).
    N, D = 128, 32
    gamma, lengthscale = 0.5, 1.5
    x1 = jax.random.normal(k1, (N, D), dtype=jnp.float32)
    x2 = jax.random.normal(k2, (N, D), dtype=jnp.float32)
    out = jax.block_until_ready(
        exponential_gamma_kernel(x1, x2, gamma=gamma, lengthscale=lengthscale))
    ref = _reference(x1, x2, gamma, lengthscale)
    np.testing.assert_allclose(np.asarray(out), np.asarray(ref),
                               rtol=2e-4, atol=2e-4)

    # Case 2: N not divisible by the tile (exercises padding) + generic gamma.
    N2, D2 = 72, 16
    gamma2, lengthscale2 = 0.3, 0.8
    y1 = jax.random.normal(k3, (N2, D2), dtype=jnp.float32)
    y2 = jax.random.normal(k4, (N2, D2), dtype=jnp.float32)
    out2 = jax.block_until_ready(
        exponential_gamma_kernel(y1, y2, gamma=gamma2, lengthscale=lengthscale2))
    ref2 = _reference(y1, y2, gamma2, lengthscale2)
    np.testing.assert_allclose(np.asarray(out2), np.asarray(ref2),
                               rtol=2e-4, atol=2e-4)

    print("KERNEL_OK")
</pallas_src>

<mosaic_0001>
module attributes {stable_mosaic.version = 11 : i64} {
  func.func @_exp_gamma_kernel(%arg0: i32, %arg1: i32, %arg2: memref<128x32xf32, #tpu.memory_space<vmem>>, %arg3: memref<128x32xf32, #tpu.memory_space<vmem>>, %arg4: memref<32x128xf32, #tpu.memory_space<vmem>>, %arg5: memref<32x128xf32, #tpu.memory_space<vmem>>, %arg6: memref<128x1xf32, #tpu.memory_space<vmem>>, %arg7: memref<128x1xf32, #tpu.memory_space<vmem>>, %arg8: memref<1x128xf32, #tpu.memory_space<vmem>>, %arg9: memref<1x128xf32, #tpu.memory_space<vmem>>, %arg10: memref<128x128xf32, #tpu.memory_space<vmem>>) attributes {dimension_semantics = [#tpu.dimension_semantics<parallel>, #tpu.dimension_semantics<parallel>], iteration_bounds = array<i64: 1, 1>, scalar_prefetch = 0 : i64, scratch_operands = 0 : i64, tpu.core_type = #tpu.core_type<tc>, window_params = [{transform_indices = @transform_0, window_bounds = array<i64: 128, 32>}, {transform_indices = @transform_1, window_bounds = array<i64: 128, 32>}, {transform_indices = @transform_2, window_bounds = array<i64: 32, 128>}, {transform_indices = @transform_3, window_bounds = array<i64: 32, 128>}, {transform_indices = @transform_4, window_bounds = array<i64: 128, 1>}, {transform_indices = @transform_5, window_bounds = array<i64: 128, 1>}, {transform_indices = @transform_6, window_bounds = array<i64: 1, 128>}, {transform_indices = @transform_7, window_bounds = array<i64: 1, 128>}, {transform_indices = @transform_8, window_bounds = array<i64: 128, 128>}]} {
    %c0 = arith.constant 0 : index
    %c0_0 = arith.constant 0 : index
    %0 = vector.load %arg6[%c0, %c0_0] : memref<128x1xf32, #tpu.memory_space<vmem>>, vector<128x1xf32>
    %c0_1 = arith.constant 0 : index
    %c0_2 = arith.constant 0 : index
    %1 = vector.load %arg9[%c0_1, %c0_2] : memref<1x128xf32, #tpu.memory_space<vmem>>, vector<1x128xf32>
    %2 = vector.broadcast %0 : vector<128x1xf32> to vector<128x128xf32>
    %3 = vector.broadcast %1 : vector<1x128xf32> to vector<128x128xf32>
    %4 = arith.addf %2, %3 : vector<128x128xf32>
    %c0_3 = arith.constant 0 : index
    %c0_4 = arith.constant 0 : index
    %5 = vector.load %arg2[%c0_3, %c0_4] : memref<128x32xf32, #tpu.memory_space<vmem>>, vector<128x32xf32>
    %c0_5 = arith.constant 0 : index
    %c0_6 = arith.constant 0 : index
    %6 = vector.load %arg5[%c0_5, %c0_6] : memref<32x128xf32, #tpu.memory_space<vmem>>, vector<32x128xf32>
    %cst = arith.constant dense<0.000000e+00> : vector<128x128xf32>
    %7 = tpu.matmul %5, %6, %cst {dimension_numbers = #tpu.dot_dimension_numbers<[1], [0], [0], [1], [0, 0, 1, 1], [], []>} : vector<128x32xf32>, vector<32x128xf32>, vector<128x128xf32> -> vector<128x128xf32>
    %cst_7 = arith.constant -0.888888895 : f32
    %8 = vector.broadcast %cst_7 : f32 to vector<128x128xf32>
    %9 = arith.mulf %8, %7 : vector<128x128xf32>
    %10 = arith.addf %4, %9 : vector<128x128xf32>
    %c0_8 = arith.constant 0 : index
    %c0_9 = arith.constant 0 : index
    %11 = vector.load %arg7[%c0_8, %c0_9] : memref<128x1xf32, #tpu.memory_space<vmem>>, vector<128x1xf32>
    %c0_10 = arith.constant 0 : index
    %c0_11 = arith.constant 0 : index
    %12 = vector.load %arg8[%c0_10, %c0_11] : memref<1x128xf32, #tpu.memory_space<vmem>>, vector<1x128xf32>
    %13 = vector.broadcast %11 : vector<128x1xf32> to vector<128x128xf32>
    %14 = vector.broadcast %12 : vector<1x128xf32> to vector<128x128xf32>
    %15 = arith.addf %13, %14 : vector<128x128xf32>
    %c0_12 = arith.constant 0 : index
    %c0_13 = arith.constant 0 : index
    %16 = vector.load %arg3[%c0_12, %c0_13] : memref<128x32xf32, #tpu.memory_space<vmem>>, vector<128x32xf32>
    %c0_14 = arith.constant 0 : index
    %c0_15 = arith.constant 0 : index
    %17 = vector.load %arg4[%c0_14, %c0_15] : memref<32x128xf32, #tpu.memory_space<vmem>>, vector<32x128xf32>
    %cst_16 = arith.constant dense<0.000000e+00> : vector<128x128xf32>
    %18 = tpu.matmul %16, %17, %cst_16 {dimension_numbers = #tpu.dot_dimension_numbers<[1], [0], [0], [1], [0, 0, 1, 1], [], []>} : vector<128x32xf32>, vector<32x128xf32>, vector<128x128xf32> -> vector<128x128xf32>
    %cst_17 = arith.constant -0.888888895 : f32
    %19 = vector.broadcast %cst_17 : f32 to vector<128x128xf32>
    %20 = arith.mulf %19, %18 : vector<128x128xf32>
    %21 = arith.addf %15, %20 : vector<128x128xf32>
    %cst_18 = arith.constant 0.000000e+00 : f32
    %22 = vector.broadcast %cst_18 : f32 to vector<128x128xf32>
    %23 = arith.maximumf %10, %22 : vector<128x128xf32>
    %24 = math.sqrt %23 : vector<128x128xf32>
    %cst_19 = arith.constant 1.000000e-36 : f32
    %25 = vector.broadcast %cst_19 : f32 to vector<128x128xf32>
    %26 = arith.maximumf %24, %25 : vector<128x128xf32>
    %cst_20 = arith.constant 0.000000e+00 : f32
    %27 = vector.broadcast %cst_20 : f32 to vector<128x128xf32>
    %28 = arith.maximumf %21, %27 : vector<128x128xf32>
    %29 = math.sqrt %28 : vector<128x128xf32>
    %cst_21 = arith.constant 1.000000e-36 : f32
    %30 = vector.broadcast %cst_21 : f32 to vector<128x128xf32>
    %31 = arith.maximumf %29, %30 : vector<128x128xf32>
    %32 = arith.addf %26, %31 : vector<128x128xf32>
    %cst_22 = arith.constant 5.000000e-01 : f32
    %33 = vector.broadcast %cst_22 : f32 to vector<128x128xf32>
    %34 = arith.mulf %33, %32 : vector<128x128xf32>
    %35 = math.sqrt %34 : vector<128x128xf32>
    %cst_23 = arith.constant 0.000000e+00 : f32
    %36 = vector.broadcast %cst_23 : f32 to vector<128x128xf32>
    %37 = arith.subf %36, %35 : vector<128x128xf32>
    %38 = math.exp %37 : vector<128x128xf32>
    %c0_24 = arith.constant 0 : index
    %c0_25 = arith.constant 0 : index
    %39 = vector.load %arg10[%c0_24, %c0_25] : memref<128x128xf32, #tpu.memory_space<vmem>>, vector<128x128xf32>
    tpu.vector_store %arg10[%c0_24, %c0_25], %38 {strides = array<i32>} : memref<128x128xf32, #tpu.memory_space<vmem>>, vector<128x128xf32>,
    return
  }
  func.func @transform_0(%arg0: i32, %arg1: i32) -> (i32, i32) {
    %c0_i32 = arith.constant 0 : i32
    %c0_i32_0 = arith.constant 0 : i32
    return %arg0, %c0_i32 : i32, i32
  }
  func.func @transform_1(%arg0: i32, %arg1: i32) -> (i32, i32) {
    %c0_i32 = arith.constant 0 : i32
    %c0_i32_0 = arith.constant 0 : i32
    return %arg0, %c0_i32 : i32, i32
  }
  func.func @transform_2(%arg0: i32, %arg1: i32) -> (i32, i32) {
    %c0_i32 = arith.constant 0 : i32
    %c0_i32_0 = arith.constant 0 : i32
    return %c0_i32, %arg1 : i32, i32
  }
  func.func @transform_3(%arg0: i32, %arg1: i32) -> (i32, i32) {
    %c0_i32 = arith.constant 0 : i32
    %c0_i32_0 = arith.constant 0 : i32
    return %c0_i32, %arg1 : i32, i32
  }
  func.func @transform_4(%arg0: i32, %arg1: i32) -> (i32, i32) {
    %c0_i32 = arith.constant 0 : i32
    %c0_i32_0 = arith.constant 0 : i32
    return %arg0, %c0_i32 : i32, i32
  }
  func.func @transform_5(%arg0: i32, %arg1: i32) -> (i32, i32) {
    %c0_i32 = arith.constant 0 : i32
    %c0_i32_0 = arith.constant 0 : i32
    return %arg0, %c0_i32 : i32, i32
  }
  func.func @transform_6(%arg0: i32, %arg1: i32) -> (i32, i32) {
    %c0_i32 = arith.constant 0 : i32
    %c0_i32_0 = arith.constant 0 : i32
    return %c0_i32, %arg1 : i32, i32
  }
  func.func @transform_7(%arg0: i32, %arg1: i32) -> (i32, i32) {
    %c0_i32 = arith.constant 0 : i32
    %c0_i32_0 = arith.constant 0 : i32
    return %c0_i32, %arg1 : i32, i32
  }
  func.func @transform_8(%arg0: i32, %arg1: i32) -> (i32, i32) {
    %c0_i32 = arith.constant 0 : i32
    return %arg0, %arg1 : i32, i32
  }
}

</mosaic_0001>

<bundles_post_ra>
// kernel: tpu_custom_call.1
= control target key start
LH: loop header
LB: loop body
LE: loop exit
PB: predicated region body
PF: predicated region fallthrough
CT: control target
= control target key end

     0   :  { %v1584_v5 = vmov 0   ;;  %vm169_vm0 = vcmask 261120   ;;  %s2524_s0 = inlined_call_operand.vmem [shape: f32[128,32], index: 0, kind: input, shape index: {}]   ;;  %s2525_s1 = inlined_call_operand.vmem [shape: f32[128,32], index: 1, kind: input, shape index: {}]   ;;  %s2526_s2 = inlined_call_operand.vmem [shape: f32[32,128], index: 2, kind: input, shape index: {}]   ;;  %s2527_s3 = inlined_call_operand.vmem [shape: f32[32,128], index: 3, kind: input, shape index: {}]   ;;  %s2528_s4 = inlined_call_operand.vmem [shape: f32[128,1], index: 4, kind: input, shape index: {}]   ;;  %s2529_s5 = inlined_call_operand.vmem [shape: f32[128,1], index: 5, kind: input, shape index: {}]   ;;  %s2530_s6 = inlined_call_operand.vmem [shape: f32[1,128], index: 6, kind: input, shape index: {}]   ;;  %s2531_s7 = inlined_call_operand.vmem [shape: f32[1,128], index: 7, kind: input, shape index: {}]   ;;  %s2532_s8 = inlined_call_operand.hbm [shape: f32[128,128], index: 8, kind: output, shape index: {}]  }
   0x1   :  { %v165_v0 = vld [vmem:[%s2527_s3] sm:$0xff]  ;;  %v166_v1 = vld [vmem:[%s2527_s3 + $0x8] sm:$0xff]  ;;  %1430 = vset.pattern.permute.xlu1 %v1584_v5  ;;  %1429 = vset.pattern.permute.xlu0 %v1584_v5  ;;  %v32_v6 = vld [vmem:[%s2528_s4 + $0x10] sm:$0xff] }
   0x2   :  { %v530_v2 = vld [vmem:[%s2526_s2] sm:$0xff]  ;;  %v1409_v3 = vpack.c.bf16 %v166_v1, %v165_v0  ;;  %v531_v4 = vld [vmem:[%s2526_s2 + $0x8] sm:$0xff]  ;;  %59 = vperm.xlu1 %1430, %v32_v6   ;;  %v167_v9 = vld [vmem:[%s2527_s3 + $0x10] sm:$0xff] }
   0x3   :  { %v30_v7 = vld [vmem:[%s2528_s4] sm:$0xff]  ;;  %v1417_v8 = vpack.c.bf16 %v531_v4, %v530_v2  ;;  %v168_v10 = vld [vmem:[%s2527_s3 + $0x18] sm:$0xff]  ;;  %v532_v11 = vld [vmem:[%s2526_s2 + $0x10] sm:$0xff] }
   0x4   :  { %49 = vperm.xlu0 %1429, %v30_v7   ;;  %1410 = vmatprep.subr.bf16.mxu0 %v1409_v3  ;;  %v1413_v12 = vpack.c.bf16 %v168_v10, %v167_v9  ;;  %v533_v13 = vld [vmem:[%s2526_s2 + $0x18] sm:$0xff]  ;;  %v31_v16 = vld [vmem:[%s2528_s4 + $0x8] sm:$0xff]  ;;  %v149_v17 = vld [vmem:[%s2524_s0] sm:$0xff] }
   0x5   :  { %v33_v14 = vld [vmem:[%s2528_s4 + $0x18] sm:$0xff]  ;;  %1418 = vmatprep.subr.bf16.mxu1 %v1417_v8  ;;  %1412 = vmatpush3.bf16.msra.mxu0 %v1409_v3  ;;  %v1421_v15 = vpack.c.bf16 %v533_v13, %v532_v11  ;;  %v514_v18 = vld [vmem:[%s2525_s1] sm:$0xff]  ;;  %v35_v19 = vld [vmem:[%s2528_s4 + $0x28] sm:$0xff] }
   0x6   :  { %1420 = vmatpush3.bf16.msra.mxu1 %v1417_v8  ;;  %1414 = vmatprep.subr.bf16.mxu0 %v1413_v12  ;;  %v150_v20 = vld [vmem:[%s2524_s0 + $0x8] sm:$0xff]  ;;  %v34_v21 = vld [vmem:[%s2528_s4 + $0x20] sm:$0xff]  ;;  %v151_v23 = vld [vmem:[%s2524_s0 + $0x10] sm:$0xff] }
   0x7   :  { %1422 = vmatprep.subr.bf16.mxu1 %v1421_v15  ;;  %64 = vperm.xlu1 %1430, %v33_v14   ;;  %v515_v22 = vld [vmem:[%s2525_s1 + $0x8] sm:$0xff]  ;;  %v516_v24 = vld [vmem:[%s2525_s1 + $0x10] sm:$0xff]  ;;  %v37_v25 = vld [vmem:[%s2528_s4 + $0x38] sm:$0xff] }
   0x8   :  { %54 = vperm.xlu0 %1429, %v31_v16   ;;  %1353 = vmatprep.mubr.msk.f32.mxu0 %vm169_vm0, %v149_v17  ;;  %v152_v26 = vld [vmem:[%s2524_s0 + $0x18] sm:$0xff]  ;;  %v36_v27 = vld [vmem:[%s2528_s4 + $0x30] sm:$0xff]  ;;  %v153_v29 = vld [vmem:[%s2524_s0 + $0x20] sm:$0xff] }
   0x9   :  { %1416 = vmatpush3.bf16.msra.mxu0 %v1413_v12  ;;  %1385 = vmatprep.mubr.msk.f32.mxu1 %vm169_vm0, %v514_v18  ;;  %v517_v28 = vld [vmem:[%s2525_s1 + $0x18] sm:$0xff]  ;;  %v518_v30 = vld [vmem:[%s2525_s1 + $0x20] sm:$0xff]  ;;  %v39_v31 = vld [vmem:[%s2528_s4 + $0x48] sm:$0xff] }
   0xa   :  { %1424 = vmatpush3.bf16.msra.mxu1 %v1421_v15  ;;  %v154_v32 = vld [vmem:[%s2524_s0 + $0x28] sm:$0xff]  ;;  %v38_v33 = vld [vmem:[%s2528_s4 + $0x40] sm:$0xff]  ;;  %v155_v35 = vld [vmem:[%s2524_s0 + $0x30] sm:$0xff] }
   0xb   :  { %74 = vperm.xlu1 %1430, %v35_v19   ;;  %v519_v34 = vld [vmem:[%s2525_s1 + $0x28] sm:$0xff]  ;;  %v520_v36 = vld [vmem:[%s2525_s1 + $0x30] sm:$0xff]  ;;  %v41_v37 = vld [vmem:[%s2528_s4 + $0x58] sm:$0xff] }
   0xc   :  { %1354 = vmatmul.mubr.msk.f32.vlgmr.msra.gmra.mrb[0].mxu0 %vm169_vm0, %v150_v20  ;;  %69 = vperm.xlu0 %1429, %v34_v21   ;;  %v156_v38 = vld [vmem:[%s2524_s0 + $0x38] sm:$0xff]  ;;  %v40_v39 = vld [vmem:[%s2528_s4 + $0x50] sm:$0xff]  ;;  %v157_v41 = vld [vmem:[%s2524_s0 + $0x40] sm:$0xff] }
   0xd   :  { %1386 = vmatmul.mubr.msk.f32.vlgmr.msra.gmra.mrb[0].mxu1 %vm169_vm0, %v515_v22  ;;  %1356 = vmatprep.mubr.msk.f32.mxu0 %vm169_vm0, %v151_v23  ;;  %v521_v40 = vld [vmem:[%s2525_s1 + $0x38] sm:$0xff]  ;;  %v522_v42 = vld [vmem:[%s2525_s1 + $0x40] sm:$0xff]  ;;  %v43_v43 = vld [vmem:[%s2528_s4 + $0x68] sm:$0xff] }
   0xe   :  { %1388 = vmatprep.mubr.msk.f32.mxu1 %vm169_vm0, %v516_v24  ;;  %v158_v44 = vld [vmem:[%s2524_s0 + $0x48] sm:$0xff]  ;;  %v42_v45 = vld [vmem:[%s2528_s4 + $0x60] sm:$0xff] }
   0xf   :  { %84 = vperm.xlu1 %1430, %v37_v25  }
  0x10   :  { %1357 = vmatmul.mubr.msk.f32.gmra.mrb[2].mxu0 %vm169_vm0, %v152_v26  ;;  %79 = vperm.xlu0 %1429, %v36_v27  }
  0x11   :  { %1389 = vmatmul.mubr.msk.f32.gmra.mrb[2].mxu1 %vm169_vm0, %v517_v28  ;;  %1359 = vmatprep.mubr.msk.f32.mxu0 %vm169_vm0, %v153_v29 }
  0x12   :  { %1391 = vmatprep.mubr.msk.f32.mxu1 %vm169_vm0, %v518_v30 }
  0x13   :  { %94 = vperm.xlu1 %1430, %v39_v31  }
  0x14   :  { %1360 = vmatmul.mubr.msk.f32.gmra.mrb[4].mxu0 %vm169_vm0, %v154_v32  ;;  %89 = vperm.xlu0 %1429, %v38_v33  }
  0x15   :  { %1392 = vmatmul.mubr.msk.f32.gmra.mrb[4].mxu1 %vm169_vm0, %v519_v34  ;;  %1362 = vmatprep.mubr.msk.f32.mxu0 %vm169_vm0, %v155_v35 }
  0x16   :  { %1394 = vmatprep.mubr.msk.f32.mxu1 %vm169_vm0, %v520_v36 }
  0x17   :  { %104 = vperm.xlu1 %1430, %v41_v37  }
  0x18   :  { %1363 = vmatmul.mubr.msk.f32.gmra.mrb[6].mxu0 %vm169_vm0, %v156_v38  ;;  %99 = vperm.xlu0 %1429, %v40_v39  }
  0x19   :  { %1395 = vmatmul.mubr.msk.f32.gmra.mrb[6].mxu1 %vm169_vm0, %v521_v40  ;;  %1365 = vmatprep.mubr.msk.f32.mxu0 %vm169_vm0, %v157_v41 }
  0x1a   :  { %13 = vsyncpa [#allocation3], 0  ;;  %1397 = vmatprep.mubr.msk.f32.mxu1 %vm169_vm0, %v522_v42  ;;  %v523_v46 = vld [vmem:[%s2525_s1 + $0x48] sm:$0xff]  ;;  %v159_v47 = vld [vmem:[%s2524_s0 + $0x50] sm:$0xff] }
  0x1b   :  { %114 = vperm.xlu1 %1430, %v43_v43   ;;  %v524_v48 = vld [vmem:[%s2525_s1 + $0x50] sm:$0xff]  ;;  %v45_v49 = vld [vmem:[%s2528_s4 + $0x78] sm:$0xff]  ;;  %v161_v53 = vld [vmem:[%s2524_s0 + $0x60] sm:$0xff] }
  0x1c   :  { %1366 = vmatmul.mubr.msk.f32.gmra.mrb[8].mxu0 %vm169_vm0, %v158_v44  ;;  %109 = vperm.xlu0 %1429, %v42_v45   ;;  %v160_v50 = vld [vmem:[%s2524_s0 + $0x58] sm:$0xff]  ;;  %v44_v51 = vld [vmem:[%s2528_s4 + $0x70] sm:$0xff]  ;;  %v526_v54 = vld [vmem:[%s2525_s1 + $0x60] sm:$0xff] }
  0x1d   :  { %1398 = vmatmul.mubr.msk.f32.gmra.mrb[8].mxu1 %vm169_vm0, %v523_v46  ;;  %1368 = vmatprep.mubr.msk.f32.mxu0 %vm169_vm0, %v159_v47  ;;  %v525_v52 = vld [vmem:[%s2525_s1 + $0x58] sm:$0xff]  ;;  %v396_v55 = vld [vmem:[%s2529_s5 + $0x8] sm:$0xff]  ;;  %v395_v57 = vld [vmem:[%s2529_s5] sm:$0xff] }
  0x1e   :  { %1400 = vmatprep.mubr.msk.f32.mxu1 %vm169_vm0, %v524_v48  ;;  %v162_v56 = vld [vmem:[%s2524_s0 + $0x68] sm:$0xff]  ;;  %v163_v59 = vld [vmem:[%s2524_s0 + $0x70] sm:$0xff]  ;;  %v398_v61 = vld [vmem:[%s2529_s5 + $0x18] sm:$0xff] }
  0x1f   :  { %124 = vperm.xlu1 %1430, %v45_v49   ;;  %v527_v58 = vld [vmem:[%s2525_s1 + $0x68] sm:$0xff]  ;;  %v528_v60 = vld [vmem:[%s2525_s1 + $0x70] sm:$0xff]  ;;  %v164_v62 = vld [vmem:[%s2524_s0 + $0x78] sm:$0xff] }
  0x20   :  { %1369 = vmatmul.mubr.msk.f32.gmra.mrb[10].mxu0 %vm169_vm0, %v160_v50  ;;  %119 = vperm.xlu0 %1429, %v44_v51   ;;  %v397_v63 = vld [vmem:[%s2529_s5 + $0x10] sm:$0xff]  ;;  %v529_v0 = vld [vmem:[%s2525_s1 + $0x78] sm:$0xff]  ;;  %v400_v1 = vld [vmem:[%s2529_s5 + $0x28] sm:$0xff] }
  0x21   :  { %1401 = vmatmul.mubr.msk.f32.gmra.mrb[10].mxu1 %vm169_vm0, %v525_v52  ;;  %1371 = vmatprep.mubr.msk.f32.mxu0 %vm169_vm0, %v161_v53  ;;  %v399_v2 = vld [vmem:[%s2529_s5 + $0x20] sm:$0xff]  ;;  %v402_v3 = vld [vmem:[%s2529_s5 + $0x38] sm:$0xff]  ;;  %v401_v4 = vld [vmem:[%s2529_s5 + $0x30] sm:$0xff] }
  0x22   :  { %1403 = vmatprep.mubr.msk.f32.mxu1 %vm169_vm0, %v526_v54  ;;  %v404_v5 = vld [vmem:[%s2529_s5 + $0x48] sm:$0xff]  ;;  %v403_v6 = vld [vmem:[%s2529_s5 + $0x40] sm:$0xff]  ;;  %v406_v7 = vld [vmem:[%s2529_s5 + $0x58] sm:$0xff] }
  0x23   :  { %419 = vperm.xlu1 %1430, %v396_v55   ;;  %v405_v8 = vld [vmem:[%s2529_s5 + $0x50] sm:$0xff]  ;;  %v408_v9 = vld [vmem:[%s2529_s5 + $0x68] sm:$0xff]  ;;  %v407_v10 = vld [vmem:[%s2529_s5 + $0x60] sm:$0xff] }
  0x24   :  { %1372 = vmatmul.mubr.msk.f32.gmra.mrb[12].mxu0 %vm169_vm0, %v162_v56  ;;  %414 = vperm.xlu0 %1429, %v395_v57   ;;  %v410_v11 = vld [vmem:[%s2529_s5 + $0x78] sm:$0xff]  ;;  %v409_v12 = vld [vmem:[%s2529_s5 + $0x70] sm:$0xff]  ;;  %v1271_v21 = vld [vmem:[%s2531_s7] ss:$0 sm:$0xff] }
  0x25   :  { %1404 = vmatmul.mubr.msk.f32.gmra.mrb[12].mxu1 %vm169_vm0, %v527_v58  ;;  %1374 = vmatprep.mubr.msk.f32.mxu0 %vm169_vm0, %v163_v59  ;;  %v1901_v45 = vld [vmem:[%s2530_s6] ss:$0 sm:$0xff] }
  0x26   :  { %1406 = vmatprep.mubr.msk.f32.mxu1 %vm169_vm0, %v528_v60 }
  0x27   :  { %429 = vperm.xlu1 %1430, %v398_v61  }
  0x28   :  { %1375 = vmatmul.mubr.msk.f32.gmra.mrb[14].mxu0 %vm169_vm0, %v164_v62  ;;  %424 = vperm.xlu0 %1429, %v397_v63  }
  0x29   :  { %1407 = vmatmul.mubr.msk.f32.gmra.mrb[14].mxu1 %vm169_vm0, %v529_v0 }
  0x2b   :  { %439 = vperm.xlu1 %1430, %v400_v1  }
  0x2c   :  { %434 = vperm.xlu0 %1429, %v399_v2  }
  0x2f   :  { %449 = vperm.xlu1 %1430, %v402_v3  }
  0x30   :  { %444 = vperm.xlu0 %1429, %v401_v4  }
  0x33   :  { %459 = vperm.xlu1 %1430, %v404_v5  }
  0x34   :  { %454 = vperm.xlu0 %1429, %v403_v6  }
  0x37   :  { %469 = vperm.xlu1 %1430, %v406_v7  }
  0x38   :  { %464 = vperm.xlu0 %1429, %v405_v8  }
  0x3b   :  { %479 = vperm.xlu1 %1430, %v408_v9  }
  0x3c   :  { %474 = vperm.xlu0 %1429, %v407_v10  }
  0x3f   :  { %489 = vperm.xlu1 %1430, %v410_v11  }
  0x40   :  { %484 = vperm.xlu0 %1429, %v409_v12  }
  0x81   :  { %v60_v13 = vpop.permute.xlu1 %59 }
  0x82   :  { %v135_v47 = vadd.f32 %v1271_v21, %v60_v13 }
  0x83   :  { %v50_v14 = vpop.permute.xlu0 %49 }
  0x84   :  { %v133_v52 = vadd.f32 %v1271_v21, %v50_v14 }
  0x86   :  { %v65_v15 = vpop.permute.xlu1 %64 }
  0x87   :  { %v55_v16 = vpop.permute.xlu0 %54  ;;  %v136_v57 = vadd.f32 %v1271_v21, %v65_v15 }
  0x88   :  { %v134_v48 = vadd.f32 %v1271_v21, %v55_v16 }
  0x8a   :  { %v75_v17 = vpop.permute.xlu1 %74 }
  0x8b   :  { %v70_v18 = vpop.permute.xlu0 %69  ;;  %v138_v62 = vadd.f32 %v1271_v21, %v75_v17 }
  0x8c   :  { %v1905_v63 = vadd.f32 %v1271_v21, %v70_v18 }
  0x8e   :  { %v85_v19 = vpop.permute.xlu1 %84 }
  0x8f   :  { %v80_v20 = vpop.permute.xlu0 %79  ;;  %v1907_v4 = vadd.f32 %v1271_v21, %v85_v19 }
  0x90   :  { %v1915_v14 = vadd.f32 %v1271_v21, %v80_v20 }
  0x92   :  { %v95_v22 = vpop.permute.xlu1 %94 }
  0x93   :  { %v90_v23 = vpop.permute.xlu0 %89  ;;  %v1917_v15 = vadd.f32 %v1271_v21, %v95_v22 }
  0x94   :  { %v1884_v24 = vadd.f32 %v1271_v21, %v90_v23 }
  0x96   :  { %v105_v25 = vpop.permute.xlu1 %104 }
  0x97   :  { %v1886_v26 = vadd.f32 %v1271_v21, %v105_v25  ;;  %v100_v27 = vpop.permute.xlu0 %99 }
  0x98   :  { %v1888_v28 = vadd.f32 %v1271_v21, %v100_v27 }
  0x9a   :  { %v115_v29 = vpop.permute.xlu1 %114 }
  0x9b   :  { %v1890_v30 = vadd.f32 %v1271_v21, %v115_v29  ;;  %v110_v31 = vpop.permute.xlu0 %109 }
  0x9c   :  { %v1892_v32 = vadd.f32 %v1271_v21, %v110_v31 }
  0x9e   :  { %v125_v33 = vpop.permute.xlu1 %124 }
  0x9f   :  { %v1894_v34 = vadd.f32 %v1271_v21, %v125_v33  ;;  %v120_v35 = vpop.permute.xlu0 %119 }
  0xa0   :  { %v1896_v36 = vadd.f32 %v1271_v21, %v120_v35 }
  0xa2   :  { %v420_v37 = vpop.permute.xlu1 %419 }
  0xa3   :  { %v415_v38 = vpop.permute.xlu0 %414  ;;  %v499_v53 = vadd.f32 %v1901_v45, %v420_v37 }
  0xa4   :  { %v498_v58 = vadd.f32 %v1901_v45, %v415_v38 }
  0xa6   :  { %v430_v39 = vpop.permute.xlu1 %429 }
  0xa7   :  { %v425_v40 = vpop.permute.xlu0 %424  ;;  %v501_v16 = vadd.f32 %v1901_v45, %v430_v39 }
  0xa8   :  { %v500_v18 = vadd.f32 %v1901_v45, %v425_v40 }
  0xaa   :  { %v440_v41 = vpop.permute.xlu1 %439 }
  0xab   :  { %v435_v42 = vpop.permute.xlu0 %434  ;;  %v503_v19 = vadd.f32 %v1901_v45, %v440_v41 }
  0xac   :  { %v1924_v23 = vadd.f32 %v1901_v45, %v435_v42 }
  0xae   :  { %v450_v43 = vpop.permute.xlu1 %449 }
  0xaf   :  { %v445_v44 = vpop.permute.xlu0 %444  ;;  %v1928_v20 = vadd.f32 %v1901_v45, %v450_v43 }
  0xb0   :  { %v1931_v21 = vadd.f32 %v1901_v45, %v445_v44 }
  0xb2   :  { %v460_v59 = vpop.permute.xlu1 %459 }
  0xb3   :  { %v455_v0 = vpop.permute.xlu0 %454  ;;  %v1934_v22 = vadd.f32 %v1901_v45, %v460_v59 }
  0xb4   :  { %v1940_v40 = vadd.f32 %v1901_v45, %v455_v0 }
  0xb6   :  { %v470_v31 = vpop.permute.xlu1 %469 }
  0xb7   :  { %v1943_v41 = vadd.f32 %v1901_v45, %v470_v31  ;;  %v465_v42 = vpop.permute.xlu0 %464 }
  0xdf   :  { %v1355_v46 = vpop.f32.mrb[0].mxu0 }
  0xe0   :  { %v364_v49 = vmul.f32 -0.8888889, %v1355_v46  ;;  %v1387_v50 = vpop.f32.mrb[0].mxu1  ;;  %v284_v51 = vpop.f32.mrb[1].mxu0  ;;  %v1946_v46 = vadd.f32 %v1901_v45, %v465_v42 }
  0xe1   :  { %v728_v54 = vmul.f32 -0.8888889, %v1387_v50  ;;  %v363_v55 = vmul.f32 -0.8888889, %v284_v51  ;;  %v648_v56 = vpop.f32.mrb[1].mxu1 }
  0xe2   :  { %v380_v60 = vadd.f32 %v364_v49, %v134_v48  ;;  %v727_v61 = vmul.f32 -0.8888889, %v648_v56 }
  0xe3   :  { %v744_v1 = vadd.f32 %v728_v54, %v499_v53  ;;  %v379_v2 = vadd.f32 %v363_v55, %v133_v52  ;;  %v1358_v3 = vpop.f32.mrb[2].mxu0 }
  0xe4   :  { %v1909_v5 = vmax.f32 %v380_v60, 0.0  ;;  %v743_v6 = vadd.f32 %v727_v61, %v498_v58  ;;  %v366_v7 = vmul.f32 -0.8888889, %v1358_v3  ;;  %v1390_v8 = vpop.f32.mrb[2].mxu1  ;;  %v294_v9 = vpop.f32.mrb[3].mxu0 }
  0xe5   :  { %v1911_v10 = vmax.f32 %v744_v1, 0.0  ;;  %v1913_v11 = vmax.f32 %v379_v2, 0.0  ;;  %v730_v12 = vmul.f32 -0.8888889, %v1390_v8  ;;  %v365_v13 = vmul.f32 -0.8888889, %v294_v9 }
  0xe6   :  { %1431 = vrsqrt.f32 %v1909_v5  ;;  %v658_v17 = vpop.f32.mrb[3].mxu1  ;;  %v1937_v33 = vmax.f32 %v743_v6, 0.0  ;;  %v382_v35 = vadd.f32 %v366_v7, %v136_v57  ;;  %vm784_vm1 = vcmp.eq.f32.partialorder %v1909_v5, inf }
  0xe7   :  { %1433 = vrsqrt.f32 %v1911_v10  ;;  %v1361_v25 = vpop.f32.mrb[4].mxu0  ;;  %v746_v37 = vadd.f32 %v730_v12, %v501_v16  ;;  %v381_v38 = vadd.f32 %v365_v13, %v135_v47  ;;  %v729_v43 = vmul.f32 -0.8888889, %v658_v17 }
  0xe8   :  { %1435 = vrsqrt.f32 %v1913_v11  ;;  %v1393_v27 = vpop.f32.mrb[4].mxu1  ;;  %v304_v29 = vpop.f32.mrb[5].mxu0  ;;  %v368_v44 = vmul.f32 -0.8888889, %v1361_v25  ;;  %vm786_vm2 = vcmp.eq.f32.partialorder %v1909_v5, 0.0  ;;  %v1953_v47 = vmax.f32 %v382_v35, 0.0 }
  0xe9   :  { %v668_v39 = vpop.f32.mrb[5].mxu1  ;;  %1437 = vrsqrt.f32 %v1937_v33  ;;  %v732_v48 = vmul.f32 -0.8888889, %v1393_v27  ;;  %v1955_v50 = vmax.f32 %v746_v37, 0.0  ;;  %v1957_v51 = vmax.f32 %v381_v38, 0.0 }
  0xea   :  { %v787_v54 = vand.u32 2147483648, %v1909_v5  ;;  %vm928_vm3 = vcmp.eq.f32.partialorder %v1911_v10, inf  ;;  %v745_v55 = vadd.f32 %v729_v43, %v500_v18  ;;  %v384_v56 = vadd.f32 %v368_v44, %v138_v62 }
  0xeb   :  { %v1950_v49 = vpop.f32.mrb[6].mxu0  ;;  %vm930_vm4 = vcmp.eq.f32.partialorder %v1911_v10, 0.0  ;;  %v931_v58 = vand.u32 2147483648, %v1911_v10  ;;  %vm777_vm5 = vcmp.eq.f32.partialorder %v1913_v11, inf  ;;  %1439 = vrsqrt.f32 %v1953_v47 }
  0xec   :  { %v1959_v52 = vpop.f32.mrb[6].mxu1  ;;  %v1961_v53 = vpop.f32.mrb[7].mxu0  ;;  %vm779_vm6 = vcmp.eq.f32.partialorder %v1913_v11, 0.0  ;;  %v780_v59 = vand.u32 2147483648, %v1913_v11  ;;  %1441 = vrsqrt.f32 %v1955_v50  ;;  %v748_v60 = vadd.f32 %v732_v48, %v503_v19 }
  0xed   :  { %v1965_v57 = vpop.f32.mrb[7].mxu1  ;;  %vm921_vm7 = vcmp.eq.f32.partialorder %v1937_v33, inf  ;;  %vm923_vm8 = vcmp.eq.f32.partialorder %v1937_v33, 0.0  ;;  %1443 = vrsqrt.f32 %v1957_v51  ;;  %v367_v0 = vmul.f32 -0.8888889, %v304_v29 }
  0xee   :  { %v924_v7 = vand.u32 2147483648, %v1937_v33  ;;  %v1985_v8 = vmax.f32 %v745_v55, 0.0  ;;  %v1987_v9 = vmax.f32 %v384_v56, 0.0  ;;  %vm798_vm9 = vcmp.eq.f32.partialorder %v1953_v47, inf }
  0xef   :  { %v1974_v61 = vpop.f32.mrb[8].mxu0  ;;  %v801_v17 = vand.u32 2147483648, %v1953_v47  ;;  %v731_v18 = vmul.f32 -0.8888889, %v668_v39  ;;  %v1999_v27 = vmax.f32 %v748_v60, 0.0  ;;  %vm800_vm10 = vcmp.eq.f32.partialorder %v1953_v47, 0.0 }
  0xf0   :  { %v1432_v62 = vpop.eup %1431  ;;  %v1979_v1 = vpop.f32.mrb[8].mxu1  ;;  %1445 = vrsqrt.f32 %v1985_v8  ;;  %vm942_vm11 = vcmp.eq.f32.partialorder %v1955_v50, inf  ;;  %v383_v37 = vadd.f32 %v367_v0, %v1905_v63  ;;  %vm944_vm12 = vcmp.eq.f32.partialorder %v1955_v50, 0.0 }
  0xf1   :  { %v1981_v2 = vpop.f32.mrb[9].mxu0  ;;  %v1434_v3 = vpop.eup %1433  ;;  %v783_v6 = vmul.f32 %v1432_v62, %v1909_v5  ;;  %1447 = vrsqrt.f32 %v1987_v9  ;;  %v945_v56 = vand.u32 2147483648, %v1955_v50  ;;  %vm791_vm13 = vcmp.eq.f32.partialorder %v1957_v51, inf }
  0xf2   :  { %v1989_v12 = vpop.f32.mrb[9].mxu1  ;;  %v1436_v13 = vpop.eup %1435  ;;  %v927_v16 = vmul.f32 %v1434_v3, %v1911_v10  ;;  %vm793_vm14 = vcmp.eq.f32.partialorder %v1957_v51, 0.0  ;;  %1449 = vrsqrt.f32 %v1999_v27  ;;  %v2039_v0 = vmul.f32 -0.8888889, %v1950_v49 }
  0xf3   :  { %v785_v19 = vsel %vm784_vm1, %v1909_v5, %v783_v6  ;;  %v776_v25 = vmul.f32 %v1436_v13, %v1913_v11  ;;  %v2001_v29 = vpop.f32.mrb[10].mxu0  ;;  %v1438_v42 = vpop.eup %1437  ;;  %vm935_vm15 = vcmp.eq.f32.partialorder %v1985_v8, inf  ;;  %vm937_vm0 = vcmp.eq.f32.partialorder %v1985_v8, 0.0 }
  0xf4   :  { %v788_v31 = vsel %vm786_vm2, %v787_v54, %v785_v19  ;;  %v929_v35 = vsel %vm928_vm3, %v1911_v10, %v927_v16  ;;  %v2011_v38 = vpop.f32.mrb[10].mxu1  ;;  %v2013_v39 = vpop.f32.mrb[11].mxu0  ;;  %v920_v55 = vmul.f32 %v1438_v42, %v1937_v33  ;;  %v794_v10 = vand.u32 2147483648, %v1957_v51 }
  0xf5   :  { %v888_v43 = vmax.f32 %v788_v31, 1e-36  ;;  %v932_v5 = vsel %vm930_vm4, %v931_v58, %v929_v35  ;;  %v778_v44 = vsel %vm777_vm5, %v1913_v11, %v776_v25  ;;  %v2022_v48 = vpop.f32.mrb[11].mxu1  ;;  %v1440_v60 = vpop.eup %1439  ;;  %v2048_v31 = vmax.f32 %v383_v37, 0.0 }
  0xf6   :  { %v1032_v63 = vmax.f32 %v932_v5, 1e-36  ;;  %v781_v54 = vsel %vm779_vm6, %v780_v59, %v778_v44  ;;  %v922_v11 = vsel %vm921_vm7, %v1937_v33, %v920_v55  ;;  %v747_v59 = vadd.f32 %v731_v18, %v1924_v23  ;;  %v1442_v13 = vpop.eup %1441 }
  0xf7   :  { %v2032_v58 = vpop.f32.mrb[12].mxu0  ;;  %v887_v16 = vmax.f32 %v781_v54, 1e-36  ;;  %v925_v19 = vsel %vm923_vm8, %v924_v7, %v922_v11  ;;  %v797_v25 = vmul.f32 %v1440_v60, %v1953_v47  ;;  %v1444_v42 = vpop.eup %1443  ;;  %v941_v18 = vmul.f32 %v1442_v13, %v1955_v50 }
  0xf8   :  { %v1048_v62 = vadd.f32 %v1032_v63, %v888_v43  ;;  %v2041_v3 = vpop.f32.mrb[12].mxu1  ;;  %v2043_v6 = vpop.f32.mrb[13].mxu0  ;;  %v1031_v49 = vmax.f32 %v925_v19, 1e-36  ;;  %v790_v33 = vmul.f32 %v1444_v42, %v1957_v51  ;;  %1451 = vrsqrt.f32 %v2048_v31 }
  0xf9   :  { %v2050_v35 = vpop.f32.mrb[13].mxu1  ;;  %v799_v43 = vsel %vm798_vm9, %v1953_v47, %v797_v25  ;;  %v938_v37 = vand.u32 2147483648, %v1985_v8  ;;  %vm812_vm1 = vcmp.eq.f32.partialorder %v1987_v9, inf  ;;  %v2067_v5 = vmax.f32 %v747_v59, 0.0 }
  0xfa   :  { %v2052_v23 = vmul.f32 0.5, %v1048_v62  ;;  %v1446_v54 = vpop.eup %1445  ;;  %v1047_v55 = vadd.f32 %v1031_v49, %v887_v16  ;;  %v802_v60 = vsel %vm800_vm10, %v801_v17, %v799_v43  ;;  %v943_v62 = vsel %vm942_vm11, %v1955_v50, %v941_v18 }
  0xfb   :  { %v2062_v7 = vpop.f32.mrb[14].mxu0  ;;  %v792_v11 = vsel %vm791_vm13, %v1957_v51, %v790_v33  ;;  %v890_v59 = vmax.f32 %v802_v60, 1e-36  ;;  %v946_v19 = vsel %vm944_vm12, %v945_v56, %v943_v62  ;;  %v934_v47 = vmul.f32 %v1446_v54, %v1985_v8  ;;  %v1448_v17 = vpop.eup %1447 }
  0xfc   :  { %1453 = vrsqrt.f32 %v2052_v23  ;;  %v2069_v44 = vpop.f32.mrb[14].mxu1  ;;  %v2071_v63 = vpop.f32.mrb[15].mxu0  ;;  %v795_v16 = vsel %vm793_vm14, %v794_v10, %v792_v11  ;;  %v2088_v25 = vmul.f32 0.5, %v1047_v55  ;;  %v1034_v42 = vmax.f32 %v946_v19, 1e-36 }
  0xfd   :  { %v2081_v13 = vpop.f32.mrb[15].mxu1  ;;  %vm814_vm2 = vcmp.eq.f32.partialorder %v1987_v9, 0.0  ;;  %v815_v49 = vand.u32 2147483648, %v1987_v9  ;;  %v936_v18 = vsel %vm935_vm15, %v1985_v8, %v934_v47  ;;  %v811_v50 = vmul.f32 %v1448_v17, %v1987_v9  ;;  %v1450_v51 = vpop.eup %1449 }
  0xfe   :  { %vm956_vm3 = vcmp.eq.f32.partialorder %v1999_v27, inf  ;;  %1455 = vrsqrt.f32 %v2067_v5  ;;  %v889_v56 = vmax.f32 %v795_v16, 1e-36  ;;  %vm958_vm4 = vcmp.eq.f32.partialorder %v1999_v27, 0.0 }
  0xff   :  { %1457 = vrsqrt.f32 %v2088_v25  ;;  %v959_v10 = vand.u32 2147483648, %v1999_v27  ;;  %v1050_v43 = vadd.f32 %v1034_v42, %v890_v59  ;;  %v939_v33 = vsel %vm937_vm0, %v938_v37, %v936_v18 }
 0x100   :  { %v813_v54 = vsel %vm812_vm1, %v1987_v9, %v811_v50  ;;  %v955_v55 = vmul.f32 %v1450_v51, %v1999_v27  ;;  %vm1088_vm5 = vcmp.eq.f32.partialorder %v2052_v23, inf  ;;  %v1033_v60 = vmax.f32 %v939_v33, 1e-36 }
 0x101   :  { %v816_v62 = vsel %vm814_vm2, %v815_v49, %v813_v54  ;;  %vm805_vm6 = vcmp.eq.f32.partialorder %v2048_v31, inf  ;;  %vm1090_vm7 = vcmp.eq.f32.partialorder %v2052_v23, 0.0  ;;  %v1091_v11 = vand.u32 2147483648, %v2052_v23 }
 0x102   :  { %v2113_v8 = vmul.f32 0.5, %v1050_v43  ;;  %v957_v37 = vsel %vm956_vm3, %v1999_v27, %v955_v55  ;;  %v1452_v59 = vpop.eup %1451  ;;  %v1049_v19 = vadd.f32 %v1033_v60, %v889_v56  ;;  %vm807_vm8 = vcmp.eq.f32.partialorder %v2048_v31, 0.0 }
 0x103   :  { %v960_v16 = vsel %vm958_vm4, %v959_v10, %v957_v37  ;;  %v386_v9 = vadd.f32 %v2039_v0, %v1907_v4  ;;  %vm1081_vm9 = vcmp.eq.f32.partialorder %v2088_v25, inf  ;;  %v892_v17 = vmax.f32 %v816_v62, 1e-36 }
 0x104   :  { %1459 = vrsqrt.f32 %v2113_v8  ;;  %v808_v42 = vand.u32 2147483648, %v2048_v31  ;;  %v2127_v18 = vmul.f32 0.5, %v1049_v19  ;;  %v1036_v50 = vmax.f32 %v960_v16, 1e-36 }
 0x105   :  { %v804_v27 = vmul.f32 %v1452_v59, %v2048_v31  ;;  %vm1083_vm10 = vcmp.eq.f32.partialorder %v2088_v25, 0.0  ;;  %v1084_v51 = vand.u32 2147483648, %v2088_v25  ;;  %v2132_v4 = vmax.f32 %v386_v9, 0.0 }
 0x106   :  { %v1454_v47 = vpop.eup %1453  ;;  %v734_v0 = vmul.f32 -0.8888889, %v1959_v52  ;;  %1461 = vrsqrt.f32 %v2127_v18  ;;  %vm949_vm11 = vcmp.eq.f32.partialorder %v2067_v5, inf  ;;  %vm951_vm12 = vcmp.eq.f32.partialorder %v2067_v5, 0.0 }
 0x107   :  { %v1087_v49 = vmul.f32 %v1454_v47, %v2052_v23  ;;  %v1052_v33 = vadd.f32 %v1036_v50, %v892_v17  ;;  %v806_v54 = vsel %vm805_vm6, %v2048_v31, %v804_v27  ;;  %v952_v52 = vand.u32 2147483648, %v2067_v5 }
 0x108   :  { %v1456_v10 = vpop.eup %1455  ;;  %v809_v62 = vsel %vm807_vm8, %v808_v42, %v806_v54  ;;  %1463 = vrsqrt.f32 %v2132_v4  ;;  %v369_v19 = vmul.f32 -0.8888889, %v1961_v53  ;;  %vm1102_vm13 = vcmp.eq.f32.partialorder %v2113_v8, inf }
 0x109   :  { %v1089_v56 = vsel %vm1088_vm5, %v2052_v23, %v1087_v49  ;;  %v1458_v55 = vpop.eup %1457  ;;  %v948_v37 = vmul.f32 %v1456_v10, %v2067_v5  ;;  %v2152_v23 = vmul.f32 0.5, %v1052_v33  ;;  %vm1104_vm14 = vcmp.eq.f32.partialorder %v2113_v8, 0.0 }
 0x10a   :  { %v1092_v43 = vsel %vm1090_vm7, %v1091_v11, %v1089_v56  ;;  %v1080_v59 = vmul.f32 %v1458_v55, %v2088_v25  ;;  %v750_v11 = vadd.f32 %v734_v0, %v1928_v20  ;;  %v1105_v47 = vand.u32 2147483648, %v2113_v8 }
 0x10b   :  { %v1192_v60 = vsub.f32 0.0, %v1092_v43  ;;  %v950_v31 = vsel %vm949_vm11, %v2067_v5, %v948_v37  ;;  %1465 = vrsqrt.f32 %v2152_v23  ;;  %v891_v20 = vmax.f32 %v809_v62, 1e-36 }
 0x10c   :  { %v1082_v9 = vsel %vm1081_vm9, %v2088_v25, %v1080_v59  ;;  %v953_v17 = vsel %vm951_vm12, %v952_v52, %v950_v31  ;;  %v733_v42 = vmul.f32 -0.8888889, %v1965_v57  ;;  %v2171_v0 = vmax.f32 %v750_v11, 0.0 }
 0x10d   :  { %v1209_v16 = vmul.f32 1.442695, %v1192_v60  ;;  %v1085_v53 = vsel %vm1083_vm10, %v1084_v51, %v1082_v9  ;;  %v1035_v27 = vmax.f32 %v953_v17, 1e-36  ;;  %v385_v56 = vadd.f32 %v369_v19, %v1915_v14 }
 0x10e   :  { %v1460_v49 = vpop.eup %1459  ;;  %v1191_v50 = vsub.f32 0.0, %v1085_v53  ;;  %vm1095_vm15 = vcmp.eq.f32.partialorder %v2127_v18, inf  ;;  %vm1097_vm0 = vcmp.eq.f32.partialorder %v2127_v18, 0.0  ;;  %v1098_v25 = vand.u32 2147483648, %v2127_v18 }
 0x10f   :  { %1467 = vpow2.f32 %v1209_v16  ;;  %v1101_v10 = vmul.f32 %v1460_v49, %v2113_v8  ;;  %v1051_v5 = vadd.f32 %v1035_v27, %v891_v20  ;;  %vm826_vm1 = vcmp.eq.f32.partialorder %v2132_v4, inf }
 0x110   :  { %v1207_v51 = vmul.f32 1.442695, %v1191_v50  ;;  %1469 = vrsqrt.f32 %v2171_v0  ;;  %v1462_v57 = vpop.eup %1461  ;;  %v2183_v14 = vmax.f32 %v385_v56, 0.0  ;;  %v749_v33 = vadd.f32 %v733_v42, %v1931_v21 }
 0x111   :  { %v1103_v43 = vsel %vm1102_vm13, %v2113_v8, %v1101_v10  ;;  %v372_v54 = vmul.f32 -0.8888889, %v1974_v61  ;;  %v1094_v55 = vmul.f32 %v1462_v57, %v2127_v18  ;;  %v2190_v60 = vmul.f32 0.5, %v1051_v5 }
 0x112   :  { %1471 = vpow2.f32 %v1207_v51  ;;  %v1106_v52 = vsel %vm1104_vm14, %v1105_v47, %v1103_v43  ;;  %v1464_v62 = vpop.eup %1463  ;;  %vm828_vm2 = vcmp.eq.f32.partialorder %v2132_v4, 0.0  ;;  %v736_v59 = vmul.f32 -0.8888889, %v1979_v1 }
 0x113   :  { %v1194_v37 = vsub.f32 0.0, %v1106_v52  ;;  %1473 = vrsqrt.f32 %v2183_v14  ;;  %v1096_v21 = vsel %vm1095_vm15, %v2127_v18, %v1094_v55  ;;  %vm1116_vm3 = vcmp.eq.f32.partialorder %v2152_v23, inf }
 0x114   :  { %1475 = vrsqrt.f32 %v2190_v60  ;;  %v829_v61 = vand.u32 2147483648, %v2132_v4  ;;  %v1099_v11 = vsel %vm1097_vm0, %v1098_v25, %v1096_v21  ;;  %vm1118_vm4 = vcmp.eq.f32.partialorder %v2152_v23, 0.0 }
 0x115   :  { %v1213_v8 = vmul.f32 1.442695, %v1194_v37  ;;  %v825_v19 = vmul.f32 %v1464_v62, %v2132_v4  ;;  %v1466_v16 = vpop.eup %1465  ;;  %v1193_v1 = vsub.f32 0.0, %v1099_v11  ;;  %v1119_v31 = vand.u32 2147483648, %v2152_v23 }
 0x116   :  { %v2206_v9 = vmax.f32 %v749_v33, 0.0  ;;  %v388_v47 = vadd.f32 %v372_v54, %v1917_v15  ;;  %v1115_v53 = vmul.f32 %v1466_v16, %v2152_v23  ;;  %v752_v17 = vadd.f32 %v736_v59, %v1934_v22 }
 0x117   :  { %1477 = vpow2.f32 %v1213_v8  ;;  %v827_v18 = vsel %vm826_vm1, %v2132_v4, %v825_v19  ;;  %v1211_v42 = vmul.f32 1.442695, %v1193_v1  ;;  %vm970_vm5 = vcmp.eq.f32.partialorder %v2171_v0, inf }
 0x118   :  { %vm972_vm6 = vcmp.eq.f32.partialorder %v2171_v0, 0.0  ;;  %1479 = vrsqrt.f32 %v2206_v9  ;;  %v1117_v15 = vsel %vm1116_vm3, %v2152_v23, %v1115_v53  ;;  %v830_v49 = vsel %vm828_vm2, %v829_v61, %v827_v18 }
 0x119   :  { %v1468_v20 = vpop.eup %1467  ;;  %v973_v50 = vand.u32 2147483648, %v2171_v0  ;;  %vm819_vm7 = vcmp.eq.f32.partialorder %v2183_v14, inf  ;;  %1481 = vpow2.f32 %v1211_v42  ;;  %v1120_v27 = vsel %vm1118_vm4, %v1119_v31, %v1117_v15 }
 0x11a   :  { %1240 = vst [vmem:[#allocation2 + $0x8] sm:$0xff] %v1468_v20  ;;  %v1470_v22 = vpop.eup %1469  ;;  %v2226_v56 = vmax.f32 %v388_v47, 0.0  ;;  %v2228_v10 = vmax.f32 %v752_v17, 0.0  ;;  %v1196_v25 = vsub.f32 0.0, %v1120_v27  ;;  %vm821_vm8 = vcmp.eq.f32.partialorder %v2183_v14, 0.0 }
 0x11b   :  { %v969_v51 = vmul.f32 %v1470_v22, %v2171_v0  ;;  %v371_v4 = vmul.f32 -0.8888889, %v1981_v2  ;;  %vm1109_vm9 = vcmp.eq.f32.partialorder %v2190_v60, inf  ;;  %vm1111_vm10 = vcmp.eq.f32.partialorder %v2190_v60, 0.0 }
 0x11c   :  { %v1472_v5 = vpop.eup %1471  ;;  %1483 = vrsqrt.f32 %v2226_v56  ;;  %v735_v23 = vmul.f32 -0.8888889, %v1989_v12  ;;  %v1217_v43 = vmul.f32 1.442695, %v1196_v25  ;;  %v894_v33 = vmax.f32 %v830_v49, 1e-36 }
 0x11d   :  { %v1474_v57 = vpop.eup %1473  ;;  %1239 = vst [vmem:[#allocation2] sm:$0xff] %v1472_v5  ;;  %v971_v54 = vsel %vm970_vm5, %v2171_v0, %v969_v51  ;;  %1485 = vrsqrt.f32 %v2228_v10  ;;  %v1112_v52 = vand.u32 2147483648, %v2190_v60  ;;  %v822_v12 = vand.u32 2147483648, %v2183_v14 }
 0x11e   :  { %v1476_v2 = vpop.eup %1475  ;;  %v974_v55 = vsel %vm972_vm6, %v973_v50, %v971_v54  ;;  %v818_v62 = vmul.f32 %v1474_v57, %v2183_v14  ;;  %1487 = vpow2.f32 %v1217_v43  ;;  %v387_v21 = vadd.f32 %v371_v4, %v1884_v24 }
 0x11f   :  { %v1108_v37 = vmul.f32 %v1476_v2, %v2190_v60  ;;  %v1038_v59 = vmax.f32 %v974_v55, 1e-36  ;;  %vm963_vm11 = vcmp.eq.f32.partialorder %v2206_v9, inf  ;;  %v751_v8 = vadd.f32 %v735_v23, %v1940_v40  ;;  %v480_v2 = vpop.permute.xlu1 %479 }
 0x120   :  { %v820_v61 = vsel %vm819_vm7, %v2183_v14, %v818_v62  ;;  %v374_v0 = vmul.f32 -0.8888889, %v2001_v29  ;;  %vm965_vm12 = vcmp.eq.f32.partialorder %v2206_v9, 0.0  ;;  %v2258_v1 = vmax.f32 %v387_v21, 0.0 }
 0x121   :  { %v1478_v11 = vpop.eup %1477  ;;  %v1110_v19 = vsel %vm1109_vm9, %v2190_v60, %v1108_v37  ;;  %v1054_v16 = vadd.f32 %v1038_v59, %v894_v33  ;;  %v823_v40 = vsel %vm821_vm8, %v822_v12, %v820_v61  ;;  %v2264_v47 = vmax.f32 %v751_v8, 0.0 }
 0x122   :  { %v1480_v24 = vpop.eup %1479  ;;  %1242 = vst [vmem:[#allocation2 + $0x18] sm:$0xff] %v1478_v11  ;;  %v1113_v31 = vsel %vm1111_vm10, %v1112_v52, %v1110_v19  ;;  %v390_v29 = vadd.f32 %v374_v0, %v1886_v26  ;;  %1489 = vrsqrt.f32 %v2258_v1  ;;  %v966_v42 = vand.u32 2147483648, %v2206_v9 }
 0x123   :  { %v1195_v20 = vsub.f32 0.0, %v1113_v31  ;;  %v2267_v53 = vmul.f32 0.5, %v1054_v16  ;;  %v962_v18 = vmul.f32 %v1480_v24, %v2206_v9  ;;  %v1482_v17 = vpop.eup %1481  ;;  %vm840_vm13 = vcmp.eq.f32.partialorder %v2226_v56, inf }
 0x124   :  { %1491 = vrsqrt.f32 %v2264_v47  ;;  %v738_v14 = vmul.f32 -0.8888889, %v2011_v38  ;;  %1241 = vst [vmem:[#allocation2 + $0x10] sm:$0xff] %v1482_v17  ;;  %vm842_vm14 = vcmp.eq.f32.partialorder %v2226_v56, 0.0  ;;  %v843_v26 = vand.u32 2147483648, %v2226_v56 }
 0x125   :  { %v1215_v60 = vmul.f32 1.442695, %v1195_v20  ;;  %1493 = vrsqrt.f32 %v2267_v53  ;;  %v893_v49 = vmax.f32 %v823_v40, 1e-36  ;;  %v964_v50 = vsel %vm963_vm11, %v2206_v9, %v962_v18  ;;  %v475_v18 = vpop.permute.xlu0 %474 }
 0x126   :  { %v1484_v15 = vpop.eup %1483  ;;  %vm984_vm15 = vcmp.eq.f32.partialorder %v2228_v10, inf  ;;  %vm986_vm0 = vcmp.eq.f32.partialorder %v2228_v10, 0.0  ;;  %v967_v38 = vsel %vm965_vm12, %v966_v42, %v964_v50  ;;  %v987_v25 = vand.u32 2147483648, %v2228_v10 }
 0x127   :  { %v1486_v22 = vpop.eup %1485  ;;  %1495 = vpow2.f32 %v1215_v60  ;;  %v839_v27 = vmul.f32 %v1484_v15, %v2226_v56  ;;  %v1037_v51 = vmax.f32 %v967_v38, 1e-36  ;;  %v2288_v5 = vmax.f32 %v390_v29, 0.0 }
 0x128   :  { %v983_v4 = vmul.f32 %v1486_v22, %v2228_v10  ;;  %v754_v23 = vadd.f32 %v738_v14, %v1943_v41  ;;  %v1488_v57 = vpop.eup %1487  ;;  %v373_v33 = vmul.f32 -0.8888889, %v2013_v39  ;;  %v737_v9 = vmul.f32 -0.8888889, %v2022_v48 }
 0x129   :  { %v841_v43 = vsel %vm840_vm13, %v2226_v56, %v839_v27  ;;  %v376_v54 = vmul.f32 -0.8888889, %v2032_v58  ;;  %1244 = vst [vmem:[#allocation2 + $0x28] sm:$0xff] %v1488_v57  ;;  %v1053_v52 = vadd.f32 %v1037_v51, %v893_v49  ;;  %1497 = vrsqrt.f32 %v2288_v5 }
 0x12a   :  { %v844_v55 = vsel %vm842_vm14, %v843_v26, %v841_v43  ;;  %v985_v41 = vsel %vm984_vm15, %v2228_v10, %v983_v4  ;;  %v2304_v62 = vadd.f32 %v1901_v45, %v480_v2  ;;  %vm833_vm1 = vcmp.eq.f32.partialorder %v2258_v1, inf }
 0x12b   :  { %v896_v39 = vmax.f32 %v844_v55, 1e-36  ;;  %v988_v48 = vsel %vm986_vm0, %v987_v25, %v985_v41  ;;  %v2309_v58 = vmul.f32 0.5, %v1053_v52  ;;  %vm835_vm2 = vcmp.eq.f32.partialorder %v2258_v1, 0.0 }
 0x12c   :  { %v1040_v12 = vmax.f32 %v988_v48, 1e-36  ;;  %v2312_v56 = vmax.f32 %v754_v23, 0.0  ;;  %v1490_v37 = vpop.eup %1489  ;;  %v836_v59 = vand.u32 2147483648, %v2258_v1  ;;  %v389_v21 = vadd.f32 %v373_v33, %v1888_v28 }
 0x12d   :  { %v753_v61 = vadd.f32 %v737_v9, %v1946_v46  ;;  %v392_v8 = vadd.f32 %v376_v54, %v1890_v30  ;;  %vm1130_vm3 = vcmp.eq.f32.partialorder %v2267_v53, inf  ;;  %vm1132_vm4 = vcmp.eq.f32.partialorder %v2267_v53, 0.0 }
 0x12e   :  { %v1492_v10 = vpop.eup %1491  ;;  %v1133_v0 = vand.u32 2147483648, %v2267_v53  ;;  %1499 = vrsqrt.f32 %v2309_v58  ;;  %v1056_v19 = vadd.f32 %v1040_v12, %v896_v39  ;;  %v832_v16 = vmul.f32 %v1490_v37, %v2258_v1 }
 0x12f   :  { %v1494_v11 = vpop.eup %1493  ;;  %v976_v24 = vmul.f32 %v1492_v10, %v2264_v47  ;;  %1501 = vrsqrt.f32 %v2312_v56  ;;  %vm977_vm5 = vcmp.eq.f32.partialorder %v2264_v47, inf  ;;  %vm979_vm6 = vcmp.eq.f32.partialorder %v2264_v47, 0.0 }
 0x130   :  { %v1129_v28 = vmul.f32 %v1494_v11, %v2267_v53  ;;  %v980_v30 = vand.u32 2147483648, %v2264_v47  ;;  %v2329_v31 = vmul.f32 0.5, %v1056_v19  ;;  %v834_v40 = vsel %vm833_vm1, %v2258_v1, %v832_v16 }
 0x131   :  { %v1496_v46 = vpop.eup %1495  ;;  %v978_v29 = vsel %vm977_vm5, %v2264_v47, %v976_v24  ;;  %v2335_v20 = vmax.f32 %v389_v21, 0.0  ;;  %v837_v42 = vsel %vm835_vm2, %v836_v59, %v834_v40  ;;  %v2342_v60 = vmax.f32 %v753_v61, 0.0 }
 0x132   :  { %1243 = vst [vmem:[#allocation2 + $0x20] sm:$0xff] %v1496_v46  ;;  %v1131_v17 = vsel %vm1130_vm3, %v2267_v53, %v1129_v28  ;;  %v981_v14 = vsel %vm979_vm6, %v980_v30, %v978_v29  ;;  %v510_v26 = vadd.f32 %v1901_v45, %v475_v18  ;;  %1503 = vrsqrt.f32 %v2329_v31 }
 0x133   :  { %v1134_v15 = vsel %vm1132_vm4, %v1133_v0, %v1131_v17  ;;  %vm854_vm7 = vcmp.eq.f32.partialorder %v2288_v5, inf  ;;  %v1498_v47 = vpop.eup %1497  ;;  %v895_v50 = vmax.f32 %v837_v42, 1e-36  ;;  %v1039_v22 = vmax.f32 %v981_v14, 1e-36 }
 0x134   :  { %v1198_v49 = vsub.f32 0.0, %v1134_v15  ;;  %vm856_vm8 = vcmp.eq.f32.partialorder %v2288_v5, 0.0  ;;  %v853_v1 = vmul.f32 %v1498_v47, %v2288_v5  ;;  %v857_v38 = vand.u32 2147483648, %v2288_v5 }
 0x135   :  { %1505 = vrsqrt.f32 %v2335_v20  ;;  %v740_v45 = vmul.f32 -0.8888889, %v2041_v3  ;;  %vm1123_vm9 = vcmp.eq.f32.partialorder %v2309_v58, inf  ;;  %v1055_v27 = vadd.f32 %v1039_v22, %v895_v50 }
 0x136   :  { %v1221_v53 = vmul.f32 1.442695, %v1198_v49  ;;  %1507 = vrsqrt.f32 %v2342_v60  ;;  %vm1125_vm10 = vcmp.eq.f32.partialorder %v2309_v58, 0.0  ;;  %v1126_v25 = vand.u32 2147483648, %v2309_v58 }
 0x137   :  { %v855_v51 = vsel %vm854_vm7, %v2288_v5, %v853_v1  ;;  %vm998_vm11 = vcmp.eq.f32.partialorder %v2312_v56, inf  ;;  %v2362_v23 = vmul.f32 0.5, %v1055_v27  ;;  %vm1000_vm12 = vcmp.eq.f32.partialorder %v2312_v56, 0.0 }
 0x138   :  { %v1500_v4 = vpop.eup %1499  ;;  %1509 = vpow2.f32 %v1221_v53  ;;  %v2365_v3 = vmax.f32 %v392_v8, 0.0  ;;  %v858_v33 = vsel %vm856_vm8, %v857_v38, %v855_v51  ;;  %v756_v9 = vadd.f32 %v740_v45, %v2304_v62 }
 0x139   :  { %v1502_v57 = vpop.eup %1501  ;;  %v1122_v43 = vmul.f32 %v1500_v4, %v2309_v58  ;;  %v375_v54 = vmul.f32 -0.8888889, %v2043_v6  ;;  %vm1144_vm13 = vcmp.eq.f32.partialorder %v2329_v31, inf  ;;  %vm1146_vm14 = vcmp.eq.f32.partialorder %v2329_v31, 0.0  ;;  %v490_v4 = vpop.permute.xlu1 %489 }
 0x13a   :  { %1511 = vrsqrt.f32 %v2362_v23  ;;  %v1001_v2 = vand.u32 2147483648, %v2312_v56  ;;  %v1147_v55 = vand.u32 2147483648, %v2329_v31  ;;  %v997_v5 = vmul.f32 %v1502_v57, %v2312_v56 }
 0x13b   :  { %v1124_v52 = vsel %vm1123_vm9, %v2309_v58, %v1122_v43  ;;  %1513 = vrsqrt.f32 %v2365_v3  ;;  %v898_v41 = vmax.f32 %v858_v33, 1e-36  ;;  %vm847_vm15 = vcmp.eq.f32.partialorder %v2335_v20, inf }
 0x13c   :  { %v1127_v6 = vsel %vm1125_vm10, %v1126_v25, %v1124_v52  ;;  %v2385_v62 = vmax.f32 %v756_v9, 0.0  ;;  %v1504_v39 = vpop.eup %1503  ;;  %v999_v12 = vsel %vm998_vm11, %v2312_v56, %v997_v5  ;;  %v391_v37 = vadd.f32 %v375_v54, %v1892_v32 }
 0x13d   :  { %v1197_v48 = vsub.f32 0.0, %v1127_v6  ;;  %v739_v59 = vmul.f32 -0.8888889, %v2050_v35  ;;  %v1143_v21 = vmul.f32 %v1504_v39, %v2329_v31  ;;  %v1002_v58 = vsel %vm1000_vm12, %v1001_v2, %v999_v12  ;;  %v1559_v6 = vld [vmem:[%s2530_s6] ss:$0 sm:$0xff]  ;;  %v485_v39 = vpop.permute.xlu0 %484  ;;  %s1585_s6 = smov [#allocation2]  }
 0x13e   :  { %vm849_vm0 = vcmp.eq.f32.partialorder %v2335_v20, 0.0  ;;  %1515 = vrsqrt.f32 %v2385_v62  ;;  %v1042_v10 = vmax.f32 %v1002_v58, 1e-36  ;;  %v850_v0 = vand.u32 2147483648, %v2335_v20  ;;  %s1260_s3 = sshll.u32 %s1585_s6, 4  ;;  %s1261_s3 = int_to_ptr.vmem [resolvable:$true] %s1260_s3 }
 0x13f   :  { %v1506_v61 = vpop.eup %1505  ;;  %v1219_v8 = vmul.f32 1.442695, %v1197_v48  ;;  %vm991_vm1 = vcmp.eq.f32.partialorder %v2342_v60, inf  ;;  %v1145_v32 = vsel %vm1144_vm13, %v2329_v31, %v1143_v21  ;;  %v2403_v56 = vmax.f32 %v391_v37, 0.0  ;;  %s1560_s0 = scalar_lea.vmem %s1261_s3, 2048  ;;  %p1565_p1 = scmp.lt.s32.totalorder %s1261_s3, %s1261_s3 }
 0x140   :  { %v1508_v11 = vpop.eup %1507  ;;  %v846_v35 = vmul.f32 %v1506_v61, %v2335_v20  ;;  %v755_v19 = vadd.f32 %v739_v59, %v510_v26  ;;  %v1148_v16 = vsel %vm1146_vm14, %v1147_v55, %v1145_v32  ;;  %v1058_v24 = vadd.f32 %v1042_v10, %v898_v41  ;;  %p1561_p0 = scmp.ne.s32.totalorder %s1261_s3, %s1560_s0  ;;  %p1566_p2 = scmp.lt.s32.totalorder %s1560_s0, %s1560_s0 }
 0x141   :  { %1517 = vpow2.f32 %v1219_v8  ;;  %v990_v28 = vmul.f32 %v1508_v11, %v2342_v60  ;;  %v1200_v46 = vsub.f32 0.0, %v1148_v16  ;;  %v994_v29 = vand.u32 2147483648, %v2342_v60 }
 0x142   :  { %v1510_v30 = vpop.eup %1509  ;;  %v848_v40 = vsel %vm847_vm15, %v2335_v20, %v846_v35  ;;  %1519 = vrsqrt.f32 %v2403_v56  ;;  %v2413_v18 = vmul.f32 0.5, %v1058_v24  ;;  %vm993_vm2 = vcmp.eq.f32.partialorder %v2342_v60, 0.0  ;;  %p1567_p3 = por %p1566_p2, %p1565_p1 }
 0x143   :  { %1246 = vst [vmem:[#allocation2 + $0x38] sm:$0xff] %v1510_v30  ;;  %v851_v31 = vsel %vm849_vm0, %v850_v0, %v848_v40  ;;  %v992_v17 = vsel %vm991_vm1, %v2342_v60, %v990_v28  ;;  %v1225_v14 = vmul.f32 1.442695, %v1200_v46  ;;  %vm1137_vm3 = vcmp.eq.f32.partialorder %v2362_v23, inf }
 0x144   :  { %v1512_v42 = vpop.eup %1511  ;;  %v897_v26 = vmax.f32 %v851_v31, 1e-36  ;;  %v995_v15 = vsel %vm993_vm2, %v994_v29, %v992_v17  ;;  %vm1139_vm4 = vcmp.eq.f32.partialorder %v2362_v23, 0.0  ;;  %v1140_v20 = vand.u32 2147483648, %v2362_v23  ;;  %p1568_p4 = pnand %p1567_p3, %p1561_p0 }
 0x145   :  { %v1514_v47 = vpop.eup %1513  ;;  %v1136_v49 = vmul.f32 %v1512_v42, %v2362_v23  ;;  %1521 = vrsqrt.f32 %v2413_v18  ;;  %v1041_v50 = vmax.f32 %v995_v15, 1e-36  ;;  %vm868_vm5 = vcmp.eq.f32.partialorder %v2365_v3, inf }
 0x146   :  { %1523 = vpow2.f32 %v1225_v14  ;;  %v867_v22 = vmul.f32 %v1514_v47, %v2365_v3  ;;  %v871_v1 = vand.u32 2147483648, %v2365_v3  ;;  %v2430_v38 = vmax.f32 %v755_v19, 0.0 }
 0x147   :  { %v1138_v60 = vsel %vm1137_vm3, %v2362_v23, %v1136_v49  ;;  %v378_v45 = vmul.f32 -0.8888889, %v2062_v7  ;;  %v1057_v25 = vadd.f32 %v1041_v50, %v897_v26  ;;  %vm870_vm6 = vcmp.eq.f32.partialorder %v2365_v3, 0.0 }
 0x148   :  { %v1516_v53 = vpop.eup %1515  ;;  %v1141_v27 = vsel %vm1139_vm4, %v1140_v20, %v1138_v60  ;;  %v869_v51 = vsel %vm868_vm5, %v2365_v3, %v867_v22  ;;  %1525 = vrsqrt.f32 %v2430_v38  ;;  %vm1012_vm7 = vcmp.eq.f32.partialorder %v2385_v62, inf }
 0x149   :  { %v1199_v57 = vsub.f32 0.0, %v1141_v27  ;;  %v872_v43 = vsel %vm870_vm6, %v871_v1, %v869_v51  ;;  %v1011_v33 = vmul.f32 %v1516_v53, %v2385_v62  ;;  %v2437_v23 = vmul.f32 0.5, %v1057_v25 }
 0x14a   :  { %v742_v7 = vmul.f32 -0.8888889, %v2069_v44  ;;  %v377_v9 = vmul.f32 -0.8888889, %v2071_v63  ;;  %v1015_v3 = vand.u32 2147483648, %v2385_v62  ;;  %v394_v55 = vadd.f32 %v378_v45, %v1894_v34 }
 0x14b   :  { %v1518_v54 = vpop.eup %1517  ;;  %v1223_v2 = vmul.f32 1.442695, %v1199_v57  ;;  %v1013_v52 = vsel %vm1012_vm7, %v2385_v62, %v1011_v33  ;;  %v513_v41 = vadd.f32 %v1559_v6, %v490_v4  ;;  %1527 = vrsqrt.f32 %v2437_v23 }
 0x14c   :  { %v1520_v5 = vpop.eup %1519  ;;  %1245 = vst [vmem:[#allocation2 + $0x30] sm:$0xff] %v1518_v54  ;;  %v900_v44 = vmax.f32 %v872_v43, 1e-36  ;;  %vm1014_vm8 = vcmp.eq.f32.partialorder %v2385_v62, 0.0  ;;  %v2451_v12 = vmax.f32 %v394_v55, 0.0  ;;  %v393_v59 = vadd.f32 %v377_v9, %v1896_v36 }
 0x14d   :  { %1529 = vpow2.f32 %v1223_v2  ;;  %v1016_v63 = vsel %vm1014_vm8, %v1015_v3, %v1013_v52  ;;  %v860_v48 = vmul.f32 %v1520_v5, %v2403_v56  ;;  %v758_v37 = vadd.f32 %v742_v7, %v513_v41 }
 0x14e   :  { %v1044_v34 = vmax.f32 %v1016_v63, 1e-36  ;;  %v741_v21 = vmul.f32 -0.8888889, %v2081_v13  ;;  %v512_v61 = vadd.f32 %v1559_v6, %v485_v39  ;;  %vm861_vm9 = vcmp.eq.f32.partialorder %v2403_v56, inf }
 0x14f   :  { %v1522_v58 = vpop.eup %1521  ;;  %1531 = vrsqrt.f32 %v2451_v12  ;;  %vm1158_vm10 = vcmp.eq.f32.partialorder %v2413_v18, inf  ;;  %v1161_v10 = vand.u32 2147483648, %v2413_v18  ;;  %v862_v11 = vsel %vm861_vm9, %v2403_v56, %v860_v48 }
 0x150   :  { %v1524_v8 = vpop.eup %1523  ;;  %v1157_v62 = vmul.f32 %v1522_v58, %v2413_v18  ;;  %v1060_v0 = vadd.f32 %v1044_v34, %v900_v44  ;;  %v2461_v36 = vmax.f32 %v758_v37, 0.0  ;;  %v2463_v13 = vmax.f32 %v393_v59, 0.0 }
 0x151   :  { %1248 = vst [vmem:[#allocation2 + $0x48] sm:$0xff] %v1524_v8  ;;  %v757_v32 = vadd.f32 %v741_v21, %v512_v61  ;;  %vm1160_vm11 = vcmp.eq.f32.partialorder %v2413_v18, 0.0  ;;  %v864_v16 = vand.u32 2147483648, %v2403_v56  ;;  %vm863_vm12 = vcmp.eq.f32.partialorder %v2403_v56, 0.0 }
 0x152   :  { %v1159_v35 = vsel %vm1158_vm10, %v2413_v18, %v1157_v62  ;;  %v2467_v19 = vmul.f32 0.5, %v1060_v0  ;;  %v1526_v24 = vpop.eup %1525  ;;  %1533 = vrsqrt.f32 %v2461_v36  ;;  %vm1005_vm13 = vcmp.eq.f32.partialorder %v2430_v38, inf }
 0x153   :  { %v1162_v28 = vsel %vm1160_vm11, %v1161_v10, %v1159_v35  ;;  %v865_v46 = vsel %vm863_vm12, %v864_v16, %v862_v11  ;;  %v1004_v40 = vmul.f32 %v1526_v24, %v2430_v38  ;;  %vm1007_vm14 = vcmp.eq.f32.partialorder %v2430_v38, 0.0 }
 0x154   :  { %v1202_v30 = vsub.f32 0.0, %v1162_v28  ;;  %1535 = vrsqrt.f32 %v2467_v19  ;;  %v1008_v31 = vand.u32 2147483648, %v2430_v38  ;;  %v899_v42 = vmax.f32 %v865_v46, 1e-36 }
 0x155   :  { %1537 = vrsqrt.f32 %v2463_v13  ;;  %v1528_v29 = vpop.eup %1527  ;;  %v1006_v14 = vsel %vm1005_vm13, %v2430_v38, %v1004_v40  ;;  %v2480_v26 = vmax.f32 %v757_v32, 0.0  ;;  %vm1151_vm15 = vcmp.eq.f32.partialorder %v2437_v23, inf }
 0x156   :  { %v1229_v18 = vmul.f32 1.442695, %v1202_v30  ;;  %v1150_v56 = vmul.f32 %v1528_v29, %v2437_v23  ;;  %v1154_v15 = vand.u32 2147483648, %v2437_v23  ;;  %v1009_v47 = vsel %vm1007_vm14, %v1008_v31, %v1006_v14 }
 0x157   :  { %v1530_v17 = vpop.eup %1529  ;;  %vm1153_vm0 = vcmp.eq.f32.partialorder %v2437_v23, 0.0  ;;  %v1043_v50 = vmax.f32 %v1009_v47, 1e-36  ;;  %vm882_vm1 = vcmp.eq.f32.partialorder %v2451_v12, inf  ;;  %v885_v45 = vand.u32 2147483648, %v2451_v12 }
 0x158   :  { %1247 = vst [vmem:[#allocation2 + $0x40] sm:$0xff] %v1530_v17  ;;  %1539 = vpow2.f32 %v1229_v18  ;;  %v1152_v20 = vsel %vm1151_vm15, %v2437_v23, %v1150_v56  ;;  %vm884_vm2 = vcmp.eq.f32.partialorder %v2451_v12, 0.0  ;;  %vm1172_vm3 = vcmp.eq.f32.partialorder %v2467_v19, inf }
 0x159   :  { %v1532_v49 = vpop.eup %1531  ;;  %1541 = vrsqrt.f32 %v2480_v26  ;;  %v1155_v22 = vsel %vm1153_vm0, %v1154_v15, %v1152_v20  ;;  %v1059_v38 = vadd.f32 %v1043_v50, %v899_v42  ;;  %vm1026_vm4 = vcmp.eq.f32.partialorder %v2461_v36, inf }
 0x15a   :  { %v881_v60 = vmul.f32 %v1532_v49, %v2451_v12  ;;  %v1201_v1 = vsub.f32 0.0, %v1155_v22  ;;  %vm1028_vm5 = vcmp.eq.f32.partialorder %v2461_v36, 0.0  ;;  %v1175_v7 = vand.u32 2147483648, %v2467_v19 }
 0x15b   :  { %v1075_v51 = vmul.f32 0.5, %v1059_v38  ;;  %v1029_v9 = vand.u32 2147483648, %v2461_v36  ;;  %vm1174_vm6 = vcmp.eq.f32.partialorder %v2467_v19, 0.0  ;;  %vm875_vm7 = vcmp.eq.f32.partialorder %v2463_v13, inf }
 0x15c   :  { %v883_v53 = vsel %vm882_vm1, %v2451_v12, %v881_v60  ;;  %v1534_v27 = vpop.eup %1533  ;;  %v1227_v25 = vmul.f32 1.442695, %v1201_v1  ;;  %v878_v44 = vand.u32 2147483648, %v2463_v13  ;;  %vm877_vm8 = vcmp.eq.f32.partialorder %v2463_v13, 0.0 }
 0x15d   :  { %v886_v4 = vsel %vm884_vm2, %v885_v45, %v883_v53  ;;  %v1025_v43 = vmul.f32 %v1534_v27, %v2461_v36  ;;  %vm1019_vm9 = vcmp.eq.f32.partialorder %v2480_v26, inf  ;;  %v1022_v21 = vand.u32 2147483648, %v2480_v26 }
 0x15e   :  { %v1536_v57 = vpop.eup %1535  ;;  %1543 = vpow2.f32 %v1227_v25  ;;  %v902_v54 = vmax.f32 %v886_v4, 1e-36  ;;  %vm1021_vm10 = vcmp.eq.f32.partialorder %v2480_v26, 0.0  ;;  %vm1165_vm11 = vcmp.eq.f32.partialorder %v1075_v51, inf }
 0x15f   :  { %v1538_v33 = vpop.eup %1537  ;;  %v1171_v23 = vmul.f32 %v1536_v57, %v2467_v19  ;;  %1545 = vrsqrt.f32 %v1075_v51  ;;  %v1027_v2 = vsel %vm1026_vm4, %v2461_v36, %v1025_v43  ;;  %v1168_v32 = vand.u32 2147483648, %v1075_v51 }
 0x160   :  { %v874_v52 = vmul.f32 %v1538_v33, %v2463_v13  ;;  %v1030_v55 = vsel %vm1028_vm5, %v1029_v9, %v1027_v2  ;;  %vm1167_vm12 = vcmp.eq.f32.partialorder %v1075_v51, 0.0 }
 0x161   :  { %v1173_v3 = vsel %vm1172_vm3, %v2467_v19, %v1171_v23  ;;  %v1046_v41 = vmax.f32 %v1030_v55, 1e-36 }
 0x162   :  { %v1540_v5 = vpop.eup %1539  ;;  %v1176_v6 = vsel %vm1174_vm6, %v1175_v7, %v1173_v3  ;;  %v876_v39 = vsel %vm875_vm7, %v2463_v13, %v874_v52 }
 0x163   :  { %v1542_v63 = vpop.eup %1541  ;;  %1250 = vst [vmem:[#allocation2 + $0x58] sm:$0xff] %v1540_v5  ;;  %v1204_v48 = vsub.f32 0.0, %v1176_v6  ;;  %v1062_v12 = vadd.f32 %v1046_v41, %v902_v54  ;;  %v879_v34 = vsel %vm877_vm8, %v878_v44, %v876_v39 }
 0x164   :  { %v1018_v37 = vmul.f32 %v1542_v63, %v2480_v26  ;;  %v901_v8 = vmax.f32 %v879_v34, 1e-36 }
 0x165   :  { %v1233_v59 = vmul.f32 1.442695, %v1204_v48  ;;  %v1078_v58 = vmul.f32 0.5, %v1062_v12 }
 0x166   :  { %v1020_v61 = vsel %vm1019_vm9, %v2480_v26, %v1018_v37 }
 0x167   :  { %1547 = vpow2.f32 %v1233_v59  ;;  %v1023_v62 = vsel %vm1021_vm10, %v1022_v21, %v1020_v61  ;;  %vm1186_vm13 = vcmp.eq.f32.partialorder %v1078_v58, inf  ;;  %v1189_v29 = vand.u32 2147483648, %v1078_v58 }
 0x168   :  { %1549 = vrsqrt.f32 %v1078_v58  ;;  %v1544_v10 = vpop.eup %1543  ;;  %v1045_v0 = vmax.f32 %v1023_v62, 1e-36  ;;  %vm1188_vm14 = vcmp.eq.f32.partialorder %v1078_v58, 0.0 }
 0x169   :  { %v1546_v11 = vpop.eup %1545  ;;  %1249 = vst [vmem:[#allocation2 + $0x50] sm:$0xff] %v1544_v10 }
 0x16a   :  { %v1164_v36 = vmul.f32 %v1546_v11, %v1075_v51  ;;  %v1061_v13 = vadd.f32 %v1045_v0, %v901_v8 }
 0x16c   :  { %v1166_v35 = vsel %vm1165_vm11, %v1075_v51, %v1164_v36  ;;  %v1077_v19 = vmul.f32 0.5, %v1061_v13 }
 0x16d   :  { %v1169_v16 = vsel %vm1167_vm12, %v1168_v32, %v1166_v35 }
 0x16e   :  { %v1203_v24 = vsub.f32 0.0, %v1169_v16  ;;  %1551 = vrsqrt.f32 %v1077_v19  ;;  %vm1179_vm15 = vcmp.eq.f32.partialorder %v1077_v19, inf  ;;  %v1182_v26 = vand.u32 2147483648, %v1077_v19 }
 0x16f   :  { %vm1181_vm0 = vcmp.eq.f32.partialorder %v1077_v19, 0.0 }
 0x170   :  { %v1231_v30 = vmul.f32 1.442695, %v1203_v24 }
 0x171   :  { %v1548_v28 = vpop.eup %1547 }
 0x172   :  { %v1550_v46 = vpop.eup %1549  ;;  %1252 = vst [vmem:[#allocation2 + $0x68] sm:$0xff] %v1548_v28  ;;  %1553 = vpow2.f32 %v1231_v30 }
 0x173   :  { %v1185_v40 = vmul.f32 %v1550_v46, %v1078_v58 }
 0x175   :  { %v1187_v18 = vsel %vm1186_vm13, %v1078_v58, %v1185_v40 }
 0x176   :  { %v1190_v31 = vsel %vm1188_vm14, %v1189_v29, %v1187_v18 }
 0x177   :  { %v1206_v17 = vsub.f32 0.0, %v1190_v31 }
 0x178   :  { %v1552_v56 = vpop.eup %1551 }
 0x179   :  { %v1237_v42 = vmul.f32 1.442695, %v1206_v17  ;;  %v1178_v14 = vmul.f32 %v1552_v56, %v1077_v19 }
 0x17b   :  { %1555 = vpow2.f32 %v1237_v42  ;;  %v1180_v15 = vsel %vm1179_vm15, %v1077_v19, %v1178_v14 }
 0x17c   :  { %v1554_v47 = vpop.eup %1553  ;;  %v1183_v49 = vsel %vm1181_vm0, %v1182_v26, %v1180_v15 }
 0x17d   :  { %1251 = vst [vmem:[#allocation2 + $0x60] sm:$0xff] %v1554_v47  ;;  %v1205_v20 = vsub.f32 0.0, %v1183_v49 }
 0x17f   :  { %v1235_v50 = vmul.f32 1.442695, %v1205_v20 }
 0x181   :  { %1557 = vpow2.f32 %v1235_v50 }
 0x185   :  { %v1556_v22 = vpop.eup %1555 }
 0x186   :  { %1254 = vst [vmem:[#allocation2 + $0x78] sm:$0xff] %v1556_v22 }
 0x18b   :  { %v1558_v60 = vpop.eup %1557 }
 0x18c   :  { %1253 = vst [vmem:[#allocation2 + $0x70] sm:$0xff] %v1558_v60 }
 0x18d   :  { %1571 = shalt.err (!%p1568_p4)
}
 0x18e   :  { %s1572_s2 = scalar_lea.hbm %s2532_s8, 2048 }
 0x18f   :  { %p1573_p5 = scmp.ne.s32.totalorder %s2532_s8, %s1572_s2  ;;  %p1576_p6 = scmp.lt.u32.totalorder %s1572_s2, %s2532_s8 }
 0x191   :  { %p1578_p7 = pnand %p1576_p6, %p1573_p5 }
 0x193   :  { %1581 = shalt.err (!%p1578_p7)
}
 0x194   :  { %s1586_s11 = smov 128   ;;  %s1587_s12 = smov 8  }
 0x195   :  { %1266 = dma.vmem_to_hbm [thread:$0]  %s1261_s3, 2048, %s2532_s8, [#allocation3], %s1586_s11, %s1586_s11, %s1587_s12  }
 0x196   :  { %1582 = dma.done.wait [#allocation3], 2048  }
 0x197   :  { %1583 = vsyncadd [#allocation3], 4294965248 }
 0x198   :  { %1270 = vsyncpa [#allocation3], 1 }

</bundles_post_ra>
